<compile_context>
chip_gen: v5e
topology: v5e:2x2
jax: 0.10.0
libtpu: 0.0.40
codegen_flags: <defaults>
</compile_context>

<pallas_src>
import jax
import jax.numpy as jnp
from jax import lax
from jax.experimental import pallas as pl
from jax.experimental.pallas import tpu as pltpu


_CONTRACT_LAST = (((1,), (1,)), ((), ()))   # [M, K] x [N, K] -> [M, N]  (x @ w.T)


def _head_kernel_single(x_ref, w_ref, b_ref, o_ref):
    # Whole problem resident in VMEM: one fused MXU matmul + bias + output cast.
    acc = lax.dot_general(
        x_ref[...].astype(w_ref.dtype), w_ref[...],
        dimension_numbers=_CONTRACT_LAST,
        preferred_element_type=jnp.float32,
    )
    o_ref[...] = (acc + b_ref[...]).astype(o_ref.dtype)


def _head_kernel_tiled(x_ref, w_ref, b_ref, o_ref, acc_ref):
    # grid axis 0 = reduction over feature (K) tiles.
    k = pl.program_id(0)

    @pl.when(k == 0)
    def _():
        acc_ref[...] = jnp.zeros_like(acc_ref)

    acc_ref[...] += lax.dot_general(
        x_ref[...].astype(w_ref.dtype), w_ref[...],
        dimension_numbers=_CONTRACT_LAST,
        preferred_element_type=jnp.float32,
    )

    @pl.when(k == pl.num_programs(0) - 1)
    def _():
        # Fused bias + cast. The tiny f32 acc scratch is kept (instead of
        # accumulating into o_ref) so the output can be emitted in out_dtype.
        o_ref[...] = (acc_ref[...] + b_ref[...]).astype(o_ref.dtype)


def _round_up(v, m):
    return (v + m - 1) // m * m


def _sublane(dtype):
    # Minimum sublane tile: 8 for 32-bit, 16 for bf16, 32 for int8.
    return max(8, 32 // jnp.dtype(dtype).itemsize)


def _vmem_plan():
    """(single-path budget bytes, vmem_limit_bytes to request) from the chip."""
    try:
        cap = int(pltpu.get_tpu_info().vmem_capacity_bytes)
    except Exception:
        cap = 64 * 1024 * 1024          # conservative fallback: v7x-sized VMEM
    budget = int(cap * 0.70)            # ~30% headroom for compiler scratch
    limit = int(cap * 0.85)
    return budget, limit


def prepare_head_params(weight, bias, compute_dtype=jnp.bfloat16):
    """Convert Linear parameters ONCE, outside the hot path.

    weight: [n_classes, F] -> held in compute_dtype (bf16 default: kernel is
            weight-DMA bound, bf16 halves HBM traffic; MXU accumulates in f32).
    bias:   [n_classes]    -> kept f32 as [1, n_classes] (added to f32 accumulator).
    """
    n_classes = weight.shape[0]
    if compute_dtype is not None:
        weight = weight.astype(compute_dtype)
    bias2d = bias.astype(jnp.float32).reshape(1, n_classes)
    return weight, bias2d


def classification_head_concat(x, weight, bias):
    """Forward pass of ClassificationHead_concat (inference; dropout = identity).

    x:      [bs, n_vars, d_model, num_patch_new]
    weight: [n_classes, F] in its *streaming* dtype (use prepare_head_params once;
            do NOT astype per call -- that re-reads/writes the whole weight in HBM).
    bias:   [1, n_classes] f32 (prepare_head_params output) or [n_classes].
    """
    bs = x.shape[0]
    n_classes, F = weight.shape
    assert x.shape[1] * x.shape[2] * x.shape[3] == F, "weight shape inconsistent with x"

    out_dtype = x.dtype
    x_flat = x.reshape(bs, F)              # == nn.Flatten(1, 3); row-major, free
    # Dropout: identity at inference time.

    if bias.ndim == 1:
        bias = bias.astype(jnp.float32).reshape(1, n_classes)

    budget, vmem_limit = _vmem_plan()

    x_item = jnp.dtype(x_flat.dtype).itemsize
    w_item = jnp.dtype(weight.dtype).itemsize
    f_lanes = _round_up(F, 128)
    # Dtype-aware (sublane, lane) padded VMEM footprint if fully resident.
    resident_bytes = (
        _round_up(bs, _sublane(x_flat.dtype)) * f_lanes * x_item
        + _round_up(n_classes, _sublane(weight.dtype)) * f_lanes * w_item
        + _round_up(bs, 8) * _round_up(n_classes, 128) * 4          # output
        + 8 * _round_up(n_classes, 128) * 4                          # bias
    )

    if resident_bytes <= budget:
        # ---- single-step path: no grid, no scratch, no pl.when -----------------
        y = pl.pallas_call(
            _head_kernel_single,
            out_shape=jax.ShapeDtypeStruct((bs, n_classes), out_dtype),
            compiler_params=pltpu.CompilerParams(vmem_limit_bytes=vmem_limit),
        )(x_flat, weight, bias)
    else:
        # ---- K-tiled fallback for very large F ----------------------------------
        bs_pad = _round_up(bs, _sublane(x_flat.dtype))
        nc_pad = _round_up(n_classes, _sublane(weight.dtype))
        # Bytes per lane of K: x double-buffered, weight triple-buffered.
        per_k_bytes = 2 * bs_pad * x_item + 3 * nc_pad * w_item
        tk_max = max(2048, (budget // per_k_bytes) // 128 * 128)   # no artificial cap
        n_steps = -(-F // tk_max)
        tk = _round_up(-(-F // n_steps), 128)
        f_pad = tk * n_steps
        if f_pad != F:                      # remainder-safe: zero-pad K (contribution-free)
            x_flat = jnp.pad(x_flat, ((0, 0), (0, f_pad - F)))
            weight = jnp.pad(weight, ((0, 0), (0, f_pad - F)))

        y = pl.pallas_call(
            _head_kernel_tiled,
            out_shape=jax.ShapeDtypeStruct((bs, n_classes), out_dtype),
            grid_spec=pltpu.PrefetchScalarGridSpec(
                num_scalar_prefetch=0,
                grid=(n_steps,),
                in_specs=[
                    pl.BlockSpec((bs, tk), lambda k: (0, k)),            # x tile
                    pl.BlockSpec((n_classes, tk), lambda k: (0, k),      # W tile, lane-major on F
                                 pipeline_mode=pl.Buffered(3)),
                    pl.BlockSpec((1, n_classes), lambda k: (0, 0)),      # bias (tiny, resident)
                ],
                out_specs=pl.BlockSpec((bs, n_classes), lambda k: (0, 0)),
                scratch_shapes=[pltpu.VMEM((bs, n_classes), jnp.float32)],
            ),
            compiler_params=pltpu.CompilerParams(
                dimension_semantics=("arbitrary",),
                vmem_limit_bytes=vmem_limit,
            ),
        )(x_flat, weight, bias)

    return y


if __name__ == "__main__":
    # Small shapes consistent with the module.
    bs, n_vars, d_model, num_patch_new, n_classes = 2, 4, 32, 8, 10
    F = n_vars * d_model * num_patch_new  # 1024

    key = jax.random.PRNGKey(0)
    kx, kw, kb = jax.random.split(key, 3)

    x = jax.random.normal(kx, (bs, n_vars, d_model, num_patch_new), dtype=jnp.float32)
    # deterministic "init" of Linear(F, n_classes) parameters
    weight = jax.random.normal(kw, (n_classes, F), dtype=jnp.float32) * (1.0 / F) ** 0.5
    bias = jax.random.normal(kb, (n_classes,), dtype=jnp.float32) * 0.01

    x2d = x.reshape(bs, F)
    y_ref_f32 = x2d @ weight.T + bias

    # ---- f32 path (no weight compression): tight check --------------------------
    w32, b32 = prepare_head_params(weight, bias, compute_dtype=None)
    y32 = jax.block_until_ready(classification_head_concat(x, w32, b32))
    assert y32.shape == (bs, n_classes)
    assert jnp.allclose(y32, y_ref_f32, atol=1e-4, rtol=1e-4)

    # ---- default bf16 weight-stream path: compare vs same-dtype reference -------
    wbf, bbf = prepare_head_params(weight, bias)           # bf16 weight, converted ONCE
    ybf = jax.block_until_ready(classification_head_concat(x, wbf, bbf))
    assert ybf.shape == (bs, n_classes)
    y_ref_bf = lax.dot_general(
        x2d.astype(jnp.bfloat16), wbf,
        dimension_numbers=_CONTRACT_LAST,
        preferred_element_type=jnp.float32,
    ) + bias
    assert jnp.allclose(ybf, y_ref_bf, atol=2e-3, rtol=2e-3)
    assert jnp.allclose(ybf, y_ref_f32, atol=5e-2, rtol=5e-2)

    print("KERNEL_OK")
</pallas_src>

<mosaic_0001>
module attributes {stable_mosaic.version = 11 : i64} {
  func.func @_head_kernel_single(%arg0: memref<2x1024xf32, #tpu.memory_space<vmem>>, %arg1: memref<10x1024xf32, #tpu.memory_space<vmem>>, %arg2: memref<1x10xf32, #tpu.memory_space<vmem>>, %arg3: memref<2x10xf32, #tpu.memory_space<vmem>>) attributes {dimension_semantics = [], scalar_prefetch = 0 : i64, scratch_operands = 0 : i64, tpu.core_type = #tpu.core_type<tc>} {
    %c0 = arith.constant 0 : index
    %c0_0 = arith.constant 0 : index
    %0 = vector.load %arg0[%c0, %c0_0] : memref<2x1024xf32, #tpu.memory_space<vmem>>, vector<2x1024xf32>
    %c0_1 = arith.constant 0 : index
    %c0_2 = arith.constant 0 : index
    %1 = vector.load %arg1[%c0_1, %c0_2] : memref<10x1024xf32, #tpu.memory_space<vmem>>, vector<10x1024xf32>
    %cst = arith.constant dense<0.000000e+00> : vector<2x10xf32>
    %2 = tpu.matmul %0, %1, %cst {dimension_numbers = #tpu.dot_dimension_numbers<[1], [1], [0], [0], [0, 0, 1, 0], [], []>} : vector<2x1024xf32>, vector<10x1024xf32>, vector<2x10xf32> -> vector<2x10xf32>
    %c0_3 = arith.constant 0 : index
    %c0_4 = arith.constant 0 : index
    %3 = vector.load %arg2[%c0_3, %c0_4] : memref<1x10xf32, #tpu.memory_space<vmem>>, vector<1x10xf32>
    %4 = vector.broadcast %3 : vector<1x10xf32> to vector<2x10xf32>
    %5 = arith.addf %2, %4 : vector<2x10xf32>
    %c0_5 = arith.constant 0 : index
    %c0_6 = arith.constant 0 : index
    %6 = vector.load %arg3[%c0_5, %c0_6] : memref<2x10xf32, #tpu.memory_space<vmem>>, vector<2x10xf32>
    tpu.vector_store %arg3[%c0_5, %c0_6], %5 {strides = array<i32>} : memref<2x10xf32, #tpu.memory_space<vmem>>, vector<2x10xf32>,
    return
  }
}

</mosaic_0001>

<bundles_post_ra>
// kernel: tpu_custom_call.1
= control target key start
LH: loop header
LB: loop body
LE: loop exit
PB: predicated region body
PF: predicated region fallthrough
CT: control target
= control target key end

     0   :  { %8 = vsyncpa [#allocation3], 0  ;;  %s389_s0 = inlined_call_operand.hbm [shape: f32[2,1024], index: 0, kind: input, shape index: {}]   ;;  %s390_s1 = inlined_call_operand.hbm [shape: f32[10,1024], index: 1, kind: input, shape index: {}]   ;;  %s391_s2 = inlined_call_operand.vmem [shape: f32[1,10], index: 2, kind: input, shape index: {}]   ;;  %s392_s3 = inlined_call_operand.hbm [shape: f32[2,10], index: 3, kind: output, shape index: {}]  }
   0x1   :  { %9 = vsyncpa [#allocation6], 0 }
   0x2   :  { %10 = vsyncpa [#allocation4], 0  ;;  %s16_s14 = sshll.u32 %s389_s0, 4  ;;  %s352_s15 = smov [#allocation2]   ;;  %s17_s14 = int_to_ptr.hbm [resolvable:$true] %s16_s14 }
   0x3   :  { %s18_s16 = sshll.u32 %s352_s15, 4  ;;  %s26_s19 = sshll.u32 %s390_s1, 4  ;;  %s19_s16 = int_to_ptr.vmem [resolvable:$true] %s18_s16  ;;  %s27_s19 = int_to_ptr.hbm [resolvable:$true] %s26_s19 }
   0x4   :  { %21 = dma.hbm_to_vmem [thread:$0]  %s17_s14, 256, %s19_s16, [#allocation3]  }
   0x5   :  { %s353_s20 = smov [#allocation5]   ;;  %s354_s22 = smov 1024  }
   0x6   :  { %s28_s21 = sshll.u32 %s353_s20, 4  ;;  %s355_s23 = smov 64   ;;  %s29_s21 = int_to_ptr.vmem [resolvable:$true] %s28_s21 }
   0x7   :  { %34 = dma.hbm_to_vmem [thread:$0]  %s27_s19, 2048, %s29_s21, [#allocation6], %s354_s22, %s354_s22, %s355_s23  }
   0x8   :  { %346 = dma.done.wait [#allocation3], 256  }
   0x9   :  { %347 = vsyncadd [#allocation3], 4294967040 }
   0xa   :  { %348 = dma.done.wait [#allocation6], 2048  }
   0xb   :  { %349 = vsyncadd [#allocation6], 4294965248  ;;  %v57_v0 = vld [vmem:[#allocation5 + $0x50] sm:$0x3]  ;;  %v55_v1 = vld [vmem:[#allocation5 + $0x40] sm:$0x3] }
   0xc   :  { %v58_v2 = vld [vmem:[#allocation5 + $0x58] sm:$0x3]  ;;  %142 = vmatpush.xpose.msra.mxu2 %v57_v0  ;;  %102 = vmatpush.xpose.msra.mxu0 %v55_v1  ;;  %v56_v3 = vld [vmem:[#allocation5 + $0x48] sm:$0x3]  ;;  %v49_v4 = vld [vmem:[#allocation5 + $0x10] sm:$0xff]  ;;  %s356_s24 = smov [#allocation7]  }
   0xd   :  { %162 = vmatpush.xpose.msra.mxu3 %v58_v2  ;;  %122 = vmatpush.xpose.msra.mxu1 %v56_v3  ;;  %v47_v5 = vld [vmem:[#allocation5] sm:$0xff]  ;;  %v45_v6 = vld [vmem:[#allocation2] sm:$0xff]  ;;  %v50_v7 = vld [vmem:[#allocation5 + $0x18] sm:$0xff]  ;;  %s255_s25 = sshll.u32 %s356_s24, 4  ;;  %s257_s28 = sshll.u32 %s392_s3, 4  ;;  %vm248_vm0 = vcmask 74752   ;;  %s256_s25 = int_to_ptr.vmem [resolvable:$true] %s255_s25  ;;  %s258_s28 = int_to_ptr.hbm [resolvable:$true] %s257_s28 }
   0xe   :  { %69 = vst [vmem:[#allocation1] ss:$4 sm:$0xff] %v45_v6  ;;  %v61_v8 = vld [vmem:[#allocation5 + $0x70] sm:$0x3]  ;;  %v48_v9 = vld [vmem:[#allocation5 + $0x8] sm:$0xff]  ;;  %v46_v13 = vld [vmem:[#allocation2 + $0x8] sm:$0xff] }
   0xf   :  { %v59_v10 = vld [vmem:[#allocation5 + $0x60] sm:$0x3]  ;;  %v62_v11 = vld [vmem:[#allocation5 + $0x78] sm:$0x3]  ;;  %v60_v12 = vld [vmem:[#allocation5 + $0x68] sm:$0x3] }
  0x10   :  { %143 = vmatpush.xpose.msra.mxu2 %v49_v4  ;;  %103 = vmatpush.xpose.msra.mxu0 %v47_v5  ;;  %71 = vst [vmem:[#allocation1 + $0x20] ss:$4 sm:$0xff] %v46_v13  ;;  %v53_v14 = vld [vmem:[#allocation5 + $0x30] sm:$0xff]  ;;  %v51_v15 = vld [vmem:[#allocation5 + $0x20] sm:$0xff]  ;;  %v54_v16 = vld [vmem:[#allocation5 + $0x38] sm:$0xff] }
  0x11   :  { %163 = vmatpush.xpose.msra.mxu3 %v50_v7  ;;  %123 = vmatpush.xpose.msra.mxu1 %v48_v9  ;;  %v52_v17 = vld [vmem:[#allocation5 + $0x28] sm:$0xff] }
  0x12   :  { %v273_v26 = vld [vmem:[%s391_s2] ss:$0 sm:$0xff] }
  0x14   :  { %222 = vmatpush.xpose.msrb.mxu2 %v61_v8  ;;  %182 = vmatpush.xpose.msrb.mxu0 %v59_v10 }
  0x15   :  { %242 = vmatpush.xpose.msrb.mxu3 %v62_v11  ;;  %202 = vmatpush.xpose.msrb.mxu1 %v60_v12  ;;  %v74_v18 = vld.sshfl [vmem:[#allocation1 + $0x10] sm:$0xff pattern:$0x73625140]  ;;  %v72_v19 = vld.sshfl [vmem:[#allocation1] sm:$0xff pattern:$0x73625140] }
  0x16   :  { %144 = vmatmul.f32.vlgmr.msra.gmra.mxu2 %v74_v18  ;;  %104 = vmatmul.f32.vlgmr.msra.gmra.mxu0 %v72_v19  ;;  %v75_v20 = vld.sshfl [vmem:[#allocation1 + $0x18] sm:$0xff pattern:$0x73625140]  ;;  %v73_v21 = vld.sshfl [vmem:[#allocation1 + $0x8] sm:$0xff pattern:$0x73625140] }
  0x17   :  { %164 = vmatmul.f32.vlgmr.msra.gmra.mxu3 %v75_v20  ;;  %124 = vmatmul.f32.vlgmr.msra.gmra.mxu1 %v73_v21  ;;  %v78_v22 = vld.sshfl [vmem:[#allocation1 + $0x30] sm:$0xff pattern:$0x73625140]  ;;  %v76_v23 = vld.sshfl [vmem:[#allocation1 + $0x20] sm:$0xff pattern:$0x73625140] }
  0x18   :  { %223 = vmatpush.xpose.msrb.mxu2 %v53_v14  ;;  %183 = vmatpush.xpose.msrb.mxu0 %v51_v15  ;;  %v79_v24 = vld.sshfl [vmem:[#allocation1 + $0x38] sm:$0xff pattern:$0x73625140]  ;;  %v77_v25 = vld.sshfl [vmem:[#allocation1 + $0x28] sm:$0xff pattern:$0x73625140] }
  0x19   :  { %243 = vmatpush.xpose.msrb.mxu3 %v54_v16  ;;  %203 = vmatpush.xpose.msrb.mxu1 %v52_v17 }
  0x1e   :  { %224 = vmatmul.f32.vlgmr.msrb.gmra.mxu2 %v78_v22  ;;  %184 = vmatmul.f32.vlgmr.msrb.gmra.mxu0 %v76_v23 }
  0x1f   :  { %244 = vmatmul.f32.vlgmr.msrb.gmra.mxu3 %v79_v24  ;;  %204 = vmatmul.f32.vlgmr.msrb.gmra.mxu1 %v77_v25 }
  0x93   :  { %v105_v27 = vpop.f32.mrf.mxu0 }
  0x94   :  { %v106_v28 = vadd.f32 %v273_v26, %v105_v27  ;;  %v125_v29 = vpop.f32.mrf.mxu1 }
  0x96   :  { %v126_v30 = vadd.f32 %v125_v29, %v106_v28 }
  0x99   :  { %v145_v31 = vpop.f32.mrf.mxu2 }
  0x9a   :  { %v146_v32 = vadd.f32 %v145_v31, %v126_v30  ;;  %v165_v33 = vpop.f32.mrf.mxu3 }
  0x9b   :  { %v185_v34 = vpop.f32.mrf.mxu0 }
  0x9c   :  { %v166_v35 = vadd.f32 %v165_v33, %v146_v32  ;;  %v205_v36 = vpop.f32.mrf.mxu1 }
  0x9e   :  { %v186_v37 = vadd.f32 %v185_v34, %v166_v35 }
  0xa0   :  { %v206_v38 = vadd.f32 %v205_v36, %v186_v37 }
  0xa1   :  { %v225_v39 = vpop.f32.mrf.mxu2 }
  0xa2   :  { %v226_v40 = vadd.f32 %v225_v39, %v206_v38  ;;  %v245_v41 = vpop.f32.mrf.mxu3 }
  0xa4   :  { %v246_v42 = vadd.f32 %v245_v41, %v226_v40 }
  0xa6   :  { %249 = vst.msk [vmem:[#allocation7] sm:$0x3] %vm248_vm0, %v246_v42 }
  0xa7   :  { %260 = dma.vmem_to_hbm [thread:$0]  %s256_s25, 32, %s258_s28, [#allocation4]  }
  0xa8   :  { %350 = dma.done.wait [#allocation4], 32  }
  0xa9   :  { %351 = vsyncadd [#allocation4], 4294967264 }
  0xaa   :  { %265 = vsyncpa [#allocation3], 1 }
  0xab   :  { %266 = vsyncpa [#allocation6], 1 }
  0xac   :  { %267 = vsyncpa [#allocation4], 1 }

</bundles_post_ra>
